<compile_context>
chip_gen: v6e
topology: v6e:2x2x1
jax: 0.10.0
libtpu: 0.0.40
codegen_flags: <defaults>
</compile_context>

<pallas_src>
import jax
import jax.numpy as jnp
from jax.experimental import pallas as pl
from jax.experimental.pallas import tpu as pltpu


def rnn_fc_kernel(x_ref, wih_ref, whh_ref, b_ref, wfc_ref, bfc_ref,
                  out_ref, proj_ref):
    """Whole ReLU-RNN + Linear forward in one kernel invocation.

    x_ref    : (T*B, D_in)   embedded tasks, time-major & flattened
    wih_ref  : (D_in, H)     input->hidden weights (transposed vs PyTorch)
    whh_ref  : (H, H)        hidden->hidden weights (transposed vs PyTorch)
    b_ref    : (1, H)        b_ih + b_hh
    wfc_ref  : (H, P)        fc weights (transposed vs PyTorch)
    bfc_ref  : (1, P)        fc bias
    out_ref  : (B, P)        prediction from the last timestep's hidden state
    proj_ref : (T, B, H)     VMEM scratch: hoisted input projection (+ bias),
                             time-major so proj_ref[t] is a free view
    """
    T, B, H = proj_ref.shape

    # ---- Phase 1 (off the sequential path):
    # ONE (T*B, D_in) x (D_in, H) matmul with the bias folded in.
    proj2d = (jnp.dot(x_ref[...], wih_ref[...],
                      preferred_element_type=jnp.float32)
              + b_ref[...])                              # (T*B, H)
    # Stage time-major; the per-t slice/store shuffle is one-shot, off the
    # serial critical path.
    for t in range(T):
        proj_ref[t] = proj2d[t * B:(t + 1) * B, :]

    # ---- Phase 2: strictly sequential recurrence; only the data-dependent
    # (B,H)x(H,H) matmul per step remains on the critical path.
    whh = whh_ref[...]
    h = jnp.zeros((B, H), jnp.float32)                   # h0 = zeros
    for t in range(T):                                   # static T, unrolled
        pre = proj_ref[t] + jnp.dot(h, whh,
                                    preferred_element_type=jnp.float32)
        h = jnp.maximum(pre, 0.0)                        # nonlinearity='relu'

    # ---- Final Linear on the last hidden state.
    out_ref[...] = (
        jnp.dot(h, wfc_ref[...], preferred_element_type=jnp.float32)
        + bfc_ref[...]).astype(out_ref.dtype)


@jax.jit
def net_forward(x, w_ih, w_hh, b, w_fc, b_fc):
    """x: (B, T, D_in) batch-first, like the PyTorch module. Returns (B, P)."""
    B, T, D_in = x.shape
    H = w_ih.shape[1]
    P = w_fc.shape[1]
    # Time-major, flattened view of x. The (B,T,D)->(T,B,D) transpose is an
    # ~86 KB one-off outside the kernel; it lets Phase 1 be a single matmul
    # whose rows are already in time-major order (free per-step views in
    # Phase 2).
    x_tm = jnp.transpose(x, (1, 0, 2)).reshape(T * B, D_in)
    return pl.pallas_call(
        rnn_fc_kernel,
        out_shape=jax.ShapeDtypeStruct((B, P), jnp.float32),
        # No grid: single invocation, every operand fully resident in VMEM
        # (total footprint < 0.5 MiB - fine on v5e/v6e and on v7x's 64 MiB).
        in_specs=[pl.BlockSpec(memory_space=pltpu.MemorySpace.VMEM)
                  for _ in range(6)],
        out_specs=pl.BlockSpec(memory_space=pltpu.MemorySpace.VMEM),
        scratch_shapes=[pltpu.VMEM((T, B, H), jnp.float32)],
    )(x_tm, w_ih, w_hh, b, w_fc, b_fc)


def reference_forward(x, w_ih, w_hh, b, w_fc, b_fc):
    """Pure-JAX reference (matches PyTorch nn.RNN(relu) + Linear semantics)."""
    B = x.shape[0]
    H = w_ih.shape[1]

    def step(h, x_t):
        h_new = jnp.maximum(x_t @ w_ih + h @ w_hh + b[0], 0.0)
        return h_new, None

    h0 = jnp.zeros((B, H), jnp.float32)
    h_last, _ = jax.lax.scan(step, h0, jnp.transpose(x, (1, 0, 2)))
    return h_last @ w_fc + b_fc[0]


if __name__ == "__main__":
    # Small-but-consistent hyperparameters:
    #   nb_objects_max = 2  -> nb_channels = 4
    #   input_dim  = nb_channels * 2 * 13 * 13 = 1352
    #   nb_primitives = 4   -> hidden_dim = 40
    nb_objects_max = 2
    nb_primitives = 4
    nb_channels = 2 * nb_objects_max
    input_dim = nb_channels * 2 * 13 * 13          # 1352
    hidden_dim = nb_primitives * 10                # 40
    batch, seq = 2, 8

    key = jax.random.PRNGKey(0)
    ks = jax.random.split(key, 7)
    scale = 1.0 / jnp.sqrt(jnp.float32(hidden_dim))

    # Deterministic synthetic parameters (stored transposed vs PyTorch).
    w_ih = jax.random.uniform(ks[0], (input_dim, hidden_dim), jnp.float32,
                              -scale, scale)
    w_hh = jax.random.uniform(ks[1], (hidden_dim, hidden_dim), jnp.float32,
                              -scale, scale)
    b_ih = jax.random.uniform(ks[2], (hidden_dim,), jnp.float32, -scale, scale)
    b_hh = jax.random.uniform(ks[3], (hidden_dim,), jnp.float32, -scale, scale)
    b = (b_ih + b_hh).reshape(1, hidden_dim)
    w_fc = jax.random.uniform(ks[4], (hidden_dim, nb_primitives), jnp.float32,
                              -scale, scale)
    b_fc = jax.random.uniform(ks[5], (nb_primitives,), jnp.float32,
                              -scale, scale).reshape(1, nb_primitives)

    # Synthetic embedded_tasks (in the real module this comes from the conv
    # feature extractor `self.fe`, which is outside forward()).
    # TODO(synk): the conv feature extractor / embed_task path is not part of
    # forward() and is not implemented here.
    x = jax.random.normal(ks[6], (batch, seq, input_dim), jnp.float32)

    out = net_forward(x, w_ih, w_hh, b, w_fc, b_fc)
    out = jax.block_until_ready(out)

    ref = reference_forward(x, w_ih, w_hh, b, w_fc, b_fc)
    assert out.shape == (batch, nb_primitives)
    assert jnp.allclose(out, ref, atol=1e-4, rtol=1e-4), (out, ref)

    print("KERNEL_OK")
</pallas_src>

<mosaic_0001>
module attributes {stable_mosaic.version = 11 : i64} {
  func.func @rnn_fc_kernel(%arg0: memref<16x1352xf32, #tpu.memory_space<vmem>>, %arg1: memref<1352x40xf32, #tpu.memory_space<vmem>>, %arg2: memref<40x40xf32, #tpu.memory_space<vmem>>, %arg3: memref<1x40xf32, #tpu.memory_space<vmem>>, %arg4: memref<40x4xf32, #tpu.memory_space<vmem>>, %arg5: memref<1x4xf32, #tpu.memory_space<vmem>>, %arg6: memref<2x4xf32, #tpu.memory_space<vmem>>, %arg7: memref<8x2x40xf32, #tpu.memory_space<vmem>>) attributes {dimension_semantics = [], scalar_prefetch = 0 : i64, scratch_operands = 1 : i64, tpu.core_type = #tpu.core_type<tc>} {
    %c0 = arith.constant 0 : index
    %c0_0 = arith.constant 0 : index
    %0 = vector.load %arg0[%c0, %c0_0] : memref<16x1352xf32, #tpu.memory_space<vmem>>, vector<16x1352xf32>
    %c0_1 = arith.constant 0 : index
    %c0_2 = arith.constant 0 : index
    %1 = vector.load %arg1[%c0_1, %c0_2] : memref<1352x40xf32, #tpu.memory_space<vmem>>, vector<1352x40xf32>
    %cst = arith.constant dense<0.000000e+00> : vector<16x40xf32>
    %2 = tpu.matmul %0, %1, %cst {dimension_numbers = #tpu.dot_dimension_numbers<[1], [0], [0], [1], [0, 0, 1, 1], [], []>} : vector<16x1352xf32>, vector<1352x40xf32>, vector<16x40xf32> -> vector<16x40xf32>
    %c0_3 = arith.constant 0 : index
    %c0_4 = arith.constant 0 : index
    %3 = vector.load %arg3[%c0_3, %c0_4] : memref<1x40xf32, #tpu.memory_space<vmem>>, vector<1x40xf32>
    %4 = vector.broadcast %3 : vector<1x40xf32> to vector<16x40xf32>
    %5 = arith.addf %2, %4 : vector<16x40xf32>
    %6 = vector.extract_strided_slice %5 {offsets = [0, 0], sizes = [2, 40], strides = [1, 1]} : vector<16x40xf32> to vector<2x40xf32>
    %c0_5 = arith.constant 0 : index
    %c0_6 = arith.constant 0 : index
    %c0_7 = arith.constant 0 : index
    %7 = vector.load %arg7[%c0_5, %c0_6, %c0_7] : memref<8x2x40xf32, #tpu.memory_space<vmem>>, vector<1x2x40xf32>
    %8 = vector.shape_cast %7 : vector<1x2x40xf32> to vector<2x40xf32>
    %9 = vector.shape_cast %6 : vector<2x40xf32> to vector<1x2x40xf32>
    tpu.vector_store %arg7[%c0_5, %c0_6, %c0_7], %9 {strides = array<i32>} : memref<8x2x40xf32, #tpu.memory_space<vmem>>, vector<1x2x40xf32>,
    %10 = vector.extract_strided_slice %5 {offsets = [2, 0], sizes = [2, 40], strides = [1, 1]} : vector<16x40xf32> to vector<2x40xf32>
    %c1 = arith.constant 1 : index
    %c0_8 = arith.constant 0 : index
    %c0_9 = arith.constant 0 : index
    %11 = vector.load %arg7[%c1, %c0_8, %c0_9] : memref<8x2x40xf32, #tpu.memory_space<vmem>>, vector<1x2x40xf32>
    %12 = vector.shape_cast %11 : vector<1x2x40xf32> to vector<2x40xf32>
    %13 = vector.shape_cast %10 : vector<2x40xf32> to vector<1x2x40xf32>
    tpu.vector_store %arg7[%c1, %c0_8, %c0_9], %13 {strides = array<i32>} : memref<8x2x40xf32, #tpu.memory_space<vmem>>, vector<1x2x40xf32>,
    %14 = vector.extract_strided_slice %5 {offsets = [4, 0], sizes = [2, 40], strides = [1, 1]} : vector<16x40xf32> to vector<2x40xf32>
    %c2 = arith.constant 2 : index
    %c0_10 = arith.constant 0 : index
    %c0_11 = arith.constant 0 : index
    %15 = vector.load %arg7[%c2, %c0_10, %c0_11] : memref<8x2x40xf32, #tpu.memory_space<vmem>>, vector<1x2x40xf32>
    %16 = vector.shape_cast %15 : vector<1x2x40xf32> to vector<2x40xf32>
    %17 = vector.shape_cast %14 : vector<2x40xf32> to vector<1x2x40xf32>
    tpu.vector_store %arg7[%c2, %c0_10, %c0_11], %17 {strides = array<i32>} : memref<8x2x40xf32, #tpu.memory_space<vmem>>, vector<1x2x40xf32>,
    %18 = vector.extract_strided_slice %5 {offsets = [6, 0], sizes = [2, 40], strides = [1, 1]} : vector<16x40xf32> to vector<2x40xf32>
    %c3 = arith.constant 3 : index
    %c0_12 = arith.constant 0 : index
    %c0_13 = arith.constant 0 : index
    %19 = vector.load %arg7[%c3, %c0_12, %c0_13] : memref<8x2x40xf32, #tpu.memory_space<vmem>>, vector<1x2x40xf32>
    %20 = vector.shape_cast %19 : vector<1x2x40xf32> to vector<2x40xf32>
    %21 = vector.shape_cast %18 : vector<2x40xf32> to vector<1x2x40xf32>
    tpu.vector_store %arg7[%c3, %c0_12, %c0_13], %21 {strides = array<i32>} : memref<8x2x40xf32, #tpu.memory_space<vmem>>, vector<1x2x40xf32>,
    %22 = vector.extract_strided_slice %5 {offsets = [8, 0], sizes = [2, 40], strides = [1, 1]} : vector<16x40xf32> to vector<2x40xf32>
    %c4 = arith.constant 4 : index
    %c0_14 = arith.constant 0 : index
    %c0_15 = arith.constant 0 : index
    %23 = vector.load %arg7[%c4, %c0_14, %c0_15] : memref<8x2x40xf32, #tpu.memory_space<vmem>>, vector<1x2x40xf32>
    %24 = vector.shape_cast %23 : vector<1x2x40xf32> to vector<2x40xf32>
    %25 = vector.shape_cast %22 : vector<2x40xf32> to vector<1x2x40xf32>
    tpu.vector_store %arg7[%c4, %c0_14, %c0_15], %25 {strides = array<i32>} : memref<8x2x40xf32, #tpu.memory_space<vmem>>, vector<1x2x40xf32>,
    %26 = vector.extract_strided_slice %5 {offsets = [10, 0], sizes = [2, 40], strides = [1, 1]} : vector<16x40xf32> to vector<2x40xf32>
    %c5 = arith.constant 5 : index
    %c0_16 = arith.constant 0 : index
    %c0_17 = arith.constant 0 : index
    %27 = vector.load %arg7[%c5, %c0_16, %c0_17] : memref<8x2x40xf32, #tpu.memory_space<vmem>>, vector<1x2x40xf32>
    %28 = vector.shape_cast %27 : vector<1x2x40xf32> to vector<2x40xf32>
    %29 = vector.shape_cast %26 : vector<2x40xf32> to vector<1x2x40xf32>
    tpu.vector_store %arg7[%c5, %c0_16, %c0_17], %29 {strides = array<i32>} : memref<8x2x40xf32, #tpu.memory_space<vmem>>, vector<1x2x40xf32>,
    %30 = vector.extract_strided_slice %5 {offsets = [12, 0], sizes = [2, 40], strides = [1, 1]} : vector<16x40xf32> to vector<2x40xf32>
    %c6 = arith.constant 6 : index
    %c0_18 = arith.constant 0 : index
    %c0_19 = arith.constant 0 : index
    %31 = vector.load %arg7[%c6, %c0_18, %c0_19] : memref<8x2x40xf32, #tpu.memory_space<vmem>>, vector<1x2x40xf32>
    %32 = vector.shape_cast %31 : vector<1x2x40xf32> to vector<2x40xf32>
    %33 = vector.shape_cast %30 : vector<2x40xf32> to vector<1x2x40xf32>
    tpu.vector_store %arg7[%c6, %c0_18, %c0_19], %33 {strides = array<i32>} : memref<8x2x40xf32, #tpu.memory_space<vmem>>, vector<1x2x40xf32>,
    %34 = vector.extract_strided_slice %5 {offsets = [14, 0], sizes = [2, 40], strides = [1, 1]} : vector<16x40xf32> to vector<2x40xf32>
    %c7 = arith.constant 7 : index
    %c0_20 = arith.constant 0 : index
    %c0_21 = arith.constant 0 : index
    %35 = vector.load %arg7[%c7, %c0_20, %c0_21] : memref<8x2x40xf32, #tpu.memory_space<vmem>>, vector<1x2x40xf32>
    %36 = vector.shape_cast %35 : vector<1x2x40xf32> to vector<2x40xf32>
    %37 = vector.shape_cast %34 : vector<2x40xf32> to vector<1x2x40xf32>
    tpu.vector_store %arg7[%c7, %c0_20, %c0_21], %37 {strides = array<i32>} : memref<8x2x40xf32, #tpu.memory_space<vmem>>, vector<1x2x40xf32>,
    %c0_22 = arith.constant 0 : index
    %c0_23 = arith.constant 0 : index
    %38 = vector.load %arg2[%c0_22, %c0_23] : memref<40x40xf32, #tpu.memory_space<vmem>>, vector<40x40xf32>
    %cst_24 = arith.constant 0.000000e+00 : f32
    %39 = vector.broadcast %cst_24 : f32 to vector<2x40xf32>
    %c0_25 = arith.constant 0 : index
    %c0_26 = arith.constant 0 : index
    %c0_27 = arith.constant 0 : index
    %40 = vector.load %arg7[%c0_25, %c0_26, %c0_27] : memref<8x2x40xf32, #tpu.memory_space<vmem>>, vector<1x2x40xf32>
    %41 = vector.shape_cast %40 : vector<1x2x40xf32> to vector<2x40xf32>
    %cst_28 = arith.constant dense<0.000000e+00> : vector<2x40xf32>
    %42 = tpu.matmul %39, %38, %cst_28 {dimension_numbers = #tpu.dot_dimension_numbers<[1], [0], [0], [1], [0, 0, 1, 1], [], []>} : vector<2x40xf32>, vector<40x40xf32>, vector<2x40xf32> -> vector<2x40xf32>
    %43 = arith.addf %41, %42 : vector<2x40xf32>
    %cst_29 = arith.constant 0.000000e+00 : f32
    %44 = vector.broadcast %cst_29 : f32 to vector<2x40xf32>
    %45 = arith.maximumf %43, %44 : vector<2x40xf32>
    %c1_30 = arith.constant 1 : index
    %c0_31 = arith.constant 0 : index
    %c0_32 = arith.constant 0 : index
    %46 = vector.load %arg7[%c1_30, %c0_31, %c0_32] : memref<8x2x40xf32, #tpu.memory_space<vmem>>, vector<1x2x40xf32>
    %47 = vector.shape_cast %46 : vector<1x2x40xf32> to vector<2x40xf32>
    %cst_33 = arith.constant dense<0.000000e+00> : vector<2x40xf32>
    %48 = tpu.matmul %45, %38, %cst_33 {dimension_numbers = #tpu.dot_dimension_numbers<[1], [0], [0], [1], [0, 0, 1, 1], [], []>} : vector<2x40xf32>, vector<40x40xf32>, vector<2x40xf32> -> vector<2x40xf32>
    %49 = arith.addf %47, %48 : vector<2x40xf32>
    %cst_34 = arith.constant 0.000000e+00 : f32
    %50 = vector.broadcast %cst_34 : f32 to vector<2x40xf32>
    %51 = arith.maximumf %49, %50 : vector<2x40xf32>
    %c2_35 = arith.constant 2 : index
    %c0_36 = arith.constant 0 : index
    %c0_37 = arith.constant 0 : index
    %52 = vector.load %arg7[%c2_35, %c0_36, %c0_37] : memref<8x2x40xf32, #tpu.memory_space<vmem>>, vector<1x2x40xf32>
    %53 = vector.shape_cast %52 : vector<1x2x40xf32> to vector<2x40xf32>
    %cst_38 = arith.constant dense<0.000000e+00> : vector<2x40xf32>
    %54 = tpu.matmul %51, %38, %cst_38 {dimension_numbers = #tpu.dot_dimension_numbers<[1], [0], [0], [1], [0, 0, 1, 1], [], []>} : vector<2x40xf32>, vector<40x40xf32>, vector<2x40xf32> -> vector<2x40xf32>
    %55 = arith.addf %53, %54 : vector<2x40xf32>
    %cst_39 = arith.constant 0.000000e+00 : f32
    %56 = vector.broadcast %cst_39 : f32 to vector<2x40xf32>
    %57 = arith.maximumf %55, %56 : vector<2x40xf32>
    %c3_40 = arith.constant 3 : index
    %c0_41 = arith.constant 0 : index
    %c0_42 = arith.constant 0 : index
    %58 = vector.load %arg7[%c3_40, %c0_41, %c0_42] : memref<8x2x40xf32, #tpu.memory_space<vmem>>, vector<1x2x40xf32>
    %59 = vector.shape_cast %58 : vector<1x2x40xf32> to vector<2x40xf32>
    %cst_43 = arith.constant dense<0.000000e+00> : vector<2x40xf32>
    %60 = tpu.matmul %57, %38, %cst_43 {dimension_numbers = #tpu.dot_dimension_numbers<[1], [0], [0], [1], [0, 0, 1, 1], [], []>} : vector<2x40xf32>, vector<40x40xf32>, vector<2x40xf32> -> vector<2x40xf32>
    %61 = arith.addf %59, %60 : vector<2x40xf32>
    %cst_44 = arith.constant 0.000000e+00 : f32
    %62 = vector.broadcast %cst_44 : f32 to vector<2x40xf32>
    %63 = arith.maximumf %61, %62 : vector<2x40xf32>
    %c4_45 = arith.constant 4 : index
    %c0_46 = arith.constant 0 : index
    %c0_47 = arith.constant 0 : index
    %64 = vector.load %arg7[%c4_45, %c0_46, %c0_47] : memref<8x2x40xf32, #tpu.memory_space<vmem>>, vector<1x2x40xf32>
    %65 = vector.shape_cast %64 : vector<1x2x40xf32> to vector<2x40xf32>
    %cst_48 = arith.constant dense<0.000000e+00> : vector<2x40xf32>
    %66 = tpu.matmul %63, %38, %cst_48 {dimension_numbers = #tpu.dot_dimension_numbers<[1], [0], [0], [1], [0, 0, 1, 1], [], []>} : vector<2x40xf32>, vector<40x40xf32>, vector<2x40xf32> -> vector<2x40xf32>
    %67 = arith.addf %65, %66 : vector<2x40xf32>
    %cst_49 = arith.constant 0.000000e+00 : f32
    %68 = vector.broadcast %cst_49 : f32 to vector<2x40xf32>
    %69 = arith.maximumf %67, %68 : vector<2x40xf32>
    %c5_50 = arith.constant 5 : index
    %c0_51 = arith.constant 0 : index
    %c0_52 = arith.constant 0 : index
    %70 = vector.load %arg7[%c5_50, %c0_51, %c0_52] : memref<8x2x40xf32, #tpu.memory_space<vmem>>, vector<1x2x40xf32>
    %71 = vector.shape_cast %70 : vector<1x2x40xf32> to vector<2x40xf32>
    %cst_53 = arith.constant dense<0.000000e+00> : vector<2x40xf32>
    %72 = tpu.matmul %69, %38, %cst_53 {dimension_numbers = #tpu.dot_dimension_numbers<[1], [0], [0], [1], [0, 0, 1, 1], [], []>} : vector<2x40xf32>, vector<40x40xf32>, vector<2x40xf32> -> vector<2x40xf32>
    %73 = arith.addf %71, %72 : vector<2x40xf32>
    %cst_54 = arith.constant 0.000000e+00 : f32
    %74 = vector.broadcast %cst_54 : f32 to vector<2x40xf32>
    %75 = arith.maximumf %73, %74 : vector<2x40xf32>
    %c6_55 = arith.constant 6 : index
    %c0_56 = arith.constant 0 : index
    %c0_57 = arith.constant 0 : index
    %76 = vector.load %arg7[%c6_55, %c0_56, %c0_57] : memref<8x2x40xf32, #tpu.memory_space<vmem>>, vector<1x2x40xf32>
    %77 = vector.shape_cast %76 : vector<1x2x40xf32> to vector<2x40xf32>
    %cst_58 = arith.constant dense<0.000000e+00> : vector<2x40xf32>
    %78 = tpu.matmul %75, %38, %cst_58 {dimension_numbers = #tpu.dot_dimension_numbers<[1], [0], [0], [1], [0, 0, 1, 1], [], []>} : vector<2x40xf32>, vector<40x40xf32>, vector<2x40xf32> -> vector<2x40xf32>
    %79 = arith.addf %77, %78 : vector<2x40xf32>
    %cst_59 = arith.constant 0.000000e+00 : f32
    %80 = vector.broadcast %cst_59 : f32 to vector<2x40xf32>
    %81 = arith.maximumf %79, %80 : vector<2x40xf32>
    %c7_60 = arith.constant 7 : index
    %c0_61 = arith.constant 0 : index
    %c0_62 = arith.constant 0 : index
    %82 = vector.load %arg7[%c7_60, %c0_61, %c0_62] : memref<8x2x40xf32, #tpu.memory_space<vmem>>, vector<1x2x40xf32>
    %83 = vector.shape_cast %82 : vector<1x2x40xf32> to vector<2x40xf32>
    %cst_63 = arith.constant dense<0.000000e+00> : vector<2x40xf32>
    %84 = tpu.matmul %81, %38, %cst_63 {dimension_numbers = #tpu.dot_dimension_numbers<[1], [0], [0], [1], [0, 0, 1, 1], [], []>} : vector<2x40xf32>, vector<40x40xf32>, vector<2x40xf32> -> vector<2x40xf32>
    %85 = arith.addf %83, %84 : vector<2x40xf32>
    %cst_64 = arith.constant 0.000000e+00 : f32
    %86 = vector.broadcast %cst_64 : f32 to vector<2x40xf32>
    %87 = arith.maximumf %85, %86 : vector<2x40xf32>
    %c0_65 = arith.constant 0 : index
    %c0_66 = arith.constant 0 : index
    %88 = vector.load %arg4[%c0_65, %c0_66] : memref<40x4xf32, #tpu.memory_space<vmem>>, vector<40x4xf32>
    %cst_67 = arith.constant dense<0.000000e+00> : vector<2x4xf32>
    %89 = tpu.matmul %87, %88, %cst_67 {dimension_numbers = #tpu.dot_dimension_numbers<[1], [0], [0], [1], [0, 0, 1, 1], [], []>} : vector<2x40xf32>, vector<40x4xf32>, vector<2x4xf32> -> vector<2x4xf32>
    %c0_68 = arith.constant 0 : index
    %c0_69 = arith.constant 0 : index
    %90 = vector.load %arg5[%c0_68, %c0_69] : memref<1x4xf32, #tpu.memory_space<vmem>>, vector<1x4xf32>
    %91 = vector.broadcast %90 : vector<1x4xf32> to vector<2x4xf32>
    %92 = arith.addf %89, %91 : vector<2x4xf32>
    %c0_70 = arith.constant 0 : index
    %c0_71 = arith.constant 0 : index
    %93 = vector.load %arg6[%c0_70, %c0_71] : memref<2x4xf32, #tpu.memory_space<vmem>>, vector<2x4xf32>
    tpu.vector_store %arg6[%c0_70, %c0_71], %92 {strides = array<i32>} : memref<2x4xf32, #tpu.memory_space<vmem>>, vector<2x4xf32>,
    return
  }
}

</mosaic_0001>

<bundles_post_ra>
// kernel: net_forward.1
= control target key start
LH: loop header
LB: loop body
LE: loop exit
PB: predicated region body
PF: predicated region fallthrough
CT: control target
= control target key end

     0   :  { %s2623_s0 = inlined_call_operand.vmem [shape: f32[16,1352], index: 0, kind: input, shape index: {}]   ;;  %s2624_s1 = inlined_call_operand.vmem [shape: f32[1352,40], index: 1, kind: input, shape index: {}]   ;;  %s2625_s2 = inlined_call_operand.vmem [shape: f32[40,40], index: 2, kind: input, shape index: {}]   ;;  %s2626_s3 = inlined_call_operand.vmem [shape: f32[1,40], index: 3, kind: input, shape index: {}]   ;;  %s2627_s4 = inlined_call_operand.vmem [shape: f32[40,4], index: 4, kind: input, shape index: {}]   ;;  %s2628_s5 = inlined_call_operand.vmem [shape: f32[1,4], index: 5, kind: input, shape index: {}]   ;;  %s2629_s6 = inlined_call_operand.hbm [shape: f32[2,4], index: 6, kind: output, shape index: {}]  }
   0x1   :  { %v77_v0 = vld [vmem:[%s2624_s1 + $0xf8] sm:$0xff]  ;;  %v76_v2 = vld [vmem:[%s2624_s1 + $0xf0] sm:$0xff]  ;;  %v75_v6 = vld [vmem:[%s2624_s1 + $0xe8] sm:$0xff] }
   0x2   :  { %v61_v1 = vld [vmem:[%s2624_s1 + $0x78] sm:$0xff]  ;;  %1425 = vmatprep.subr.mxu0 %v77_v0  ;;  %v60_v4 = vld [vmem:[%s2624_s1 + $0x70] sm:$0xff]  ;;  %v59_v8 = vld [vmem:[%s2624_s1 + $0x68] sm:$0xff] }
   0x3   :  { %v109_v3 = vld [vmem:[%s2624_s1 + $0x1f8] sm:$0xff]  ;;  %1426 = vmatpush3.msra.mxu0 %v61_v1  ;;  %v108_v7 = vld [vmem:[%s2624_s1 + $0x1f0] sm:$0xff]  ;;  %v107_v10 = vld [vmem:[%s2624_s1 + $0x1e8] sm:$0xff] }
   0x4   :  { %v93_v5 = vld [vmem:[%s2624_s1 + $0x178] sm:$0xff]  ;;  %1463 = vmatprep.subr.mxu1 %v109_v3  ;;  %1427 = vmatprep.subr.mxu0 %v76_v2  ;;  %v92_v9 = vld [vmem:[%s2624_s1 + $0x170] sm:$0xff]  ;;  %v74_v11 = vld [vmem:[%s2624_s1 + $0xe0] sm:$0xff] }
   0x5   :  { %1464 = vmatpush3.msra.mxu1 %v93_v5  ;;  %1428 = vmatpush3.msra.mxu0 %v60_v4  ;;  %v91_v12 = vld [vmem:[%s2624_s1 + $0x168] sm:$0xff]  ;;  %v58_v13 = vld [vmem:[%s2624_s1 + $0x60] sm:$0xff]  ;;  %v73_v15 = vld [vmem:[%s2624_s1 + $0xd8] sm:$0xff] }
   0x6   :  { %1465 = vmatprep.subr.mxu1 %v108_v7  ;;  %1429 = vmatprep.subr.mxu0 %v75_v6  ;;  %v106_v14 = vld [vmem:[%s2624_s1 + $0x1e0] sm:$0xff]  ;;  %v57_v17 = vld [vmem:[%s2624_s1 + $0x58] sm:$0xff]  ;;  %v72_v19 = vld [vmem:[%s2624_s1 + $0xd0] sm:$0xff] }
   0x7   :  { %1466 = vmatpush3.msra.mxu1 %v92_v9  ;;  %1430 = vmatpush3.msra.mxu0 %v59_v8  ;;  %v90_v16 = vld [vmem:[%s2624_s1 + $0x160] sm:$0xff]  ;;  %v105_v18 = vld [vmem:[%s2624_s1 + $0x1d8] sm:$0xff]  ;;  %v56_v21 = vld [vmem:[%s2624_s1 + $0x50] sm:$0xff] }
   0x8   :  { %1467 = vmatprep.subr.mxu1 %v107_v10  ;;  %1431 = vmatprep.subr.mxu0 %v74_v11  ;;  %v89_v20 = vld [vmem:[%s2624_s1 + $0x158] sm:$0xff]  ;;  %v104_v22 = vld [vmem:[%s2624_s1 + $0x1d0] sm:$0xff]  ;;  %v71_v23 = vld [vmem:[%s2624_s1 + $0xc8] sm:$0xff] }
   0x9   :  { %1468 = vmatpush3.msra.mxu1 %v91_v12  ;;  %1432 = vmatpush3.msra.mxu0 %v58_v13  ;;  %v88_v24 = vld [vmem:[%s2624_s1 + $0x150] sm:$0xff]  ;;  %v55_v25 = vld [vmem:[%s2624_s1 + $0x48] sm:$0xff]  ;;  %v70_v27 = vld [vmem:[%s2624_s1 + $0xc0] sm:$0xff] }
   0xa   :  { %1469 = vmatprep.subr.mxu1 %v106_v14  ;;  %1433 = vmatprep.subr.mxu0 %v73_v15  ;;  %v103_v26 = vld [vmem:[%s2624_s1 + $0x1c8] sm:$0xff]  ;;  %v54_v29 = vld [vmem:[%s2624_s1 + $0x40] sm:$0xff]  ;;  %v69_v31 = vld [vmem:[%s2624_s1 + $0xb8] sm:$0xff] }
   0xb   :  { %1470 = vmatpush3.msra.mxu1 %v90_v16  ;;  %1434 = vmatpush3.msra.mxu0 %v57_v17  ;;  %v87_v28 = vld [vmem:[%s2624_s1 + $0x148] sm:$0xff]  ;;  %v102_v30 = vld [vmem:[%s2624_s1 + $0x1c0] sm:$0xff]  ;;  %v53_v33 = vld [vmem:[%s2624_s1 + $0x38] sm:$0xff] }
   0xc   :  { %1471 = vmatprep.subr.mxu1 %v105_v18  ;;  %1435 = vmatprep.subr.mxu0 %v72_v19  ;;  %v86_v32 = vld [vmem:[%s2624_s1 + $0x140] sm:$0xff]  ;;  %v101_v34 = vld [vmem:[%s2624_s1 + $0x1b8] sm:$0xff]  ;;  %v68_v35 = vld [vmem:[%s2624_s1 + $0xb0] sm:$0xff] }
   0xd   :  { %1472 = vmatpush3.msra.mxu1 %v89_v20  ;;  %1436 = vmatpush3.msra.mxu0 %v56_v21  ;;  %v85_v36 = vld [vmem:[%s2624_s1 + $0x138] sm:$0xff]  ;;  %v52_v37 = vld [vmem:[%s2624_s1 + $0x30] sm:$0xff]  ;;  %v67_v39 = vld [vmem:[%s2624_s1 + $0xa8] sm:$0xff] }
   0xe   :  { %1473 = vmatprep.subr.mxu1 %v104_v22  ;;  %1437 = vmatprep.subr.mxu0 %v71_v23  ;;  %v100_v38 = vld [vmem:[%s2624_s1 + $0x1b0] sm:$0xff]  ;;  %v51_v41 = vld [vmem:[%s2624_s1 + $0x28] sm:$0xff]  ;;  %v66_v43 = vld [vmem:[%s2624_s1 + $0xa0] sm:$0xff] }
   0xf   :  { %1474 = vmatpush3.msra.mxu1 %v88_v24  ;;  %1438 = vmatpush3.msra.mxu0 %v55_v25  ;;  %v84_v40 = vld [vmem:[%s2624_s1 + $0x130] sm:$0xff]  ;;  %v99_v42 = vld [vmem:[%s2624_s1 + $0x1a8] sm:$0xff]  ;;  %v50_v45 = vld [vmem:[%s2624_s1 + $0x20] sm:$0xff] }
  0x10   :  { %1475 = vmatprep.subr.mxu1 %v103_v26  ;;  %1439 = vmatprep.subr.mxu0 %v70_v27  ;;  %v83_v44 = vld [vmem:[%s2624_s1 + $0x128] sm:$0xff]  ;;  %v98_v46 = vld [vmem:[%s2624_s1 + $0x1a0] sm:$0xff]  ;;  %v65_v47 = vld [vmem:[%s2624_s1 + $0x98] sm:$0xff] }
  0x11   :  { %1476 = vmatpush3.msra.mxu1 %v87_v28  ;;  %1440 = vmatpush3.msra.mxu0 %v54_v29  ;;  %v82_v48 = vld [vmem:[%s2624_s1 + $0x120] sm:$0xff]  ;;  %v49_v49 = vld [vmem:[%s2624_s1 + $0x18] sm:$0xff]  ;;  %v64_v51 = vld [vmem:[%s2624_s1 + $0x90] sm:$0xff] }
  0x12   :  { %1477 = vmatprep.subr.mxu1 %v102_v30  ;;  %1441 = vmatprep.subr.mxu0 %v69_v31  ;;  %v97_v50 = vld [vmem:[%s2624_s1 + $0x198] sm:$0xff]  ;;  %v48_v53 = vld [vmem:[%s2624_s1 + $0x10] sm:$0xff]  ;;  %v63_v55 = vld [vmem:[%s2624_s1 + $0x88] sm:$0xff] }
  0x13   :  { %1478 = vmatpush3.msra.mxu1 %v86_v32  ;;  %1442 = vmatpush3.msra.mxu0 %v53_v33  ;;  %v81_v52 = vld [vmem:[%s2624_s1 + $0x118] sm:$0xff]  ;;  %v96_v54 = vld [vmem:[%s2624_s1 + $0x190] sm:$0xff]  ;;  %v47_v57 = vld [vmem:[%s2624_s1 + $0x8] sm:$0xff] }
  0x14   :  { %1479 = vmatprep.subr.mxu1 %v101_v34  ;;  %1443 = vmatprep.subr.mxu0 %v68_v35  ;;  %v80_v56 = vld [vmem:[%s2624_s1 + $0x110] sm:$0xff]  ;;  %v95_v58 = vld [vmem:[%s2624_s1 + $0x188] sm:$0xff]  ;;  %v62_v59 = vld [vmem:[%s2624_s1 + $0x80] sm:$0xff] }
  0x15   :  { %1480 = vmatpush3.msra.mxu1 %v85_v36  ;;  %1444 = vmatpush3.msra.mxu0 %v52_v37  ;;  %v25_v60 = vld [vmem:[%s2623_s0 + $0x8] sm:$0xff]  ;;  %v46_v61 = vld [vmem:[%s2624_s1] sm:$0xff]  ;;  %v141_v1 = vld [vmem:[%s2624_s1 + $0x2f8] sm:$0xff] }
  0x16   :  { %1481 = vmatprep.subr.mxu1 %v100_v38  ;;  %1445 = vmatprep.subr.mxu0 %v67_v39  ;;  %v79_v62 = vld [vmem:[%s2624_s1 + $0x108] sm:$0xff]  ;;  %v24_v63 = vld [vmem:[%s2623_s0] sm:$0xff]  ;;  %v27_v3 = vld [vmem:[%s2623_s0 + $0x18] sm:$0xff] }
  0x17   :  { %1482 = vmatpush3.msra.mxu1 %v84_v40  ;;  %1446 = vmatpush3.msra.mxu0 %v51_v41  ;;  %v94_v0 = vld [vmem:[%s2624_s1 + $0x180] sm:$0xff]  ;;  %v125_v4 = vld [vmem:[%s2624_s1 + $0x278] sm:$0xff]  ;;  %v26_v5 = vld [vmem:[%s2623_s0 + $0x10] sm:$0xff] }
  0x18   :  { %1483 = vmatprep.subr.mxu1 %v99_v42  ;;  %1447 = vmatprep.subr.mxu0 %v66_v43  ;;  %v78_v2 = vld [vmem:[%s2624_s1 + $0x100] sm:$0xff]  ;;  %v140_v6 = vld [vmem:[%s2624_s1 + $0x2f0] sm:$0xff]  ;;  %v173_v7 = vld [vmem:[%s2624_s1 + $0x3f8] sm:$0xff] }
  0x19   :  { %1484 = vmatpush3.msra.mxu1 %v83_v44  ;;  %1448 = vmatpush3.msra.mxu0 %v50_v45  ;;  %v124_v8 = vld [vmem:[%s2624_s1 + $0x270] sm:$0xff]  ;;  %v157_v9 = vld [vmem:[%s2624_s1 + $0x378] sm:$0xff]  ;;  %v139_v10 = vld [vmem:[%s2624_s1 + $0x2e8] sm:$0xff] }
  0x1a   :  { %1485 = vmatprep.subr.mxu1 %v98_v46  ;;  %1449 = vmatprep.subr.mxu0 %v65_v47  ;;  %v172_v11 = vld [vmem:[%s2624_s1 + $0x3f0] sm:$0xff]  ;;  %v123_v12 = vld [vmem:[%s2624_s1 + $0x268] sm:$0xff]  ;;  %v138_v14 = vld [vmem:[%s2624_s1 + $0x2e0] sm:$0xff] }
  0x1b   :  { %1486 = vmatpush3.msra.mxu1 %v82_v48  ;;  %1450 = vmatpush3.msra.mxu0 %v49_v49  ;;  %v156_v13 = vld [vmem:[%s2624_s1 + $0x370] sm:$0xff]  ;;  %v171_v15 = vld [vmem:[%s2624_s1 + $0x3e8] sm:$0xff]  ;;  %v122_v16 = vld [vmem:[%s2624_s1 + $0x260] sm:$0xff] }
  0x1c   :  { %1487 = vmatprep.subr.mxu1 %v97_v50  ;;  %1451 = vmatprep.subr.mxu0 %v64_v51  ;;  %v155_v17 = vld [vmem:[%s2624_s1 + $0x368] sm:$0xff]  ;;  %v137_v18 = vld [vmem:[%s2624_s1 + $0x2d8] sm:$0xff]  ;;  %v170_v19 = vld [vmem:[%s2624_s1 + $0x3e0] sm:$0xff] }
  0x1d   :  { %1488 = vmatpush3.msra.mxu1 %v81_v52  ;;  %1452 = vmatpush3.msra.mxu0 %v48_v53  ;;  %v121_v20 = vld [vmem:[%s2624_s1 + $0x258] sm:$0xff]  ;;  %v154_v21 = vld [vmem:[%s2624_s1 + $0x360] sm:$0xff]  ;;  %v136_v22 = vld [vmem:[%s2624_s1 + $0x2d0] sm:$0xff] }
  0x1e   :  { %1489 = vmatprep.subr.mxu1 %v96_v54  ;;  %1453 = vmatprep.subr.mxu0 %v63_v55  ;;  %v169_v23 = vld [vmem:[%s2624_s1 + $0x3d8] sm:$0xff]  ;;  %v120_v24 = vld [vmem:[%s2624_s1 + $0x250] sm:$0xff]  ;;  %v135_v26 = vld [vmem:[%s2624_s1 + $0x2c8] sm:$0xff] }
  0x1f   :  { %1490 = vmatpush3.msra.mxu1 %v80_v56  ;;  %1454 = vmatpush3.msra.mxu0 %v47_v57  ;;  %v153_v25 = vld [vmem:[%s2624_s1 + $0x358] sm:$0xff]  ;;  %v168_v27 = vld [vmem:[%s2624_s1 + $0x3d0] sm:$0xff]  ;;  %v119_v28 = vld [vmem:[%s2624_s1 + $0x248] sm:$0xff] }
  0x20   :  { %1491 = vmatprep.subr.mxu1 %v95_v58  ;;  %1455 = vmatprep.subr.mxu0 %v62_v59  ;;  %v152_v29 = vld [vmem:[%s2624_s1 + $0x350] sm:$0xff]  ;;  %v134_v30 = vld [vmem:[%s2624_s1 + $0x2c0] sm:$0xff]  ;;  %v167_v31 = vld [vmem:[%s2624_s1 + $0x3c8] sm:$0xff] }
  0x21   :  { %293 = vmatprep.mubr.f32.mxu0 %v25_v60  ;;  %1456 = vmatpush3.msra.mxu0 %v46_v61  ;;  %v118_v32 = vld [vmem:[%s2624_s1 + $0x240] sm:$0xff]  ;;  %v151_v33 = vld [vmem:[%s2624_s1 + $0x348] sm:$0xff]  ;;  %v133_v34 = vld [vmem:[%s2624_s1 + $0x2b8] sm:$0xff] }
  0x22   :  { %1492 = vmatpush3.msra.mxu1 %v79_v62  ;;  %294 = vmatmul.mubr.f32.vlgmr.msra.gmra.mxu0 %v24_v63  ;;  %v166_v35 = vld [vmem:[%s2624_s1 + $0x3c0] sm:$0xff]  ;;  %v117_v36 = vld [vmem:[%s2624_s1 + $0x238] sm:$0xff]  ;;  %v132_v38 = vld [vmem:[%s2624_s1 + $0x2b0] sm:$0xff] }
  0x23   :  { %1493 = vmatprep.subr.mxu1 %v94_v0  ;;  %1501 = vmatprep.subr.mxu0 %v141_v1  ;;  %v150_v37 = vld [vmem:[%s2624_s1 + $0x340] sm:$0xff]  ;;  %v165_v39 = vld [vmem:[%s2624_s1 + $0x3b8] sm:$0xff]  ;;  %v116_v40 = vld [vmem:[%s2624_s1 + $0x230] sm:$0xff] }
  0x24   :  { %1494 = vmatpush3.msra.mxu1 %v78_v2  ;;  %368 = vmatprep.mubr.f32.mxu1 %v27_v3  ;;  %v149_v41 = vld [vmem:[%s2624_s1 + $0x338] sm:$0xff]  ;;  %v131_v42 = vld [vmem:[%s2624_s1 + $0x2a8] sm:$0xff]  ;;  %v164_v43 = vld [vmem:[%s2624_s1 + $0x3b0] sm:$0xff] }
  0x25   :  { %1502 = vmatpush3.msra.mxu0 %v125_v4  ;;  %369 = vmatmul.mubr.f32.vlgmr.msra.gmra.mxu1 %v26_v5  ;;  %v115_v44 = vld [vmem:[%s2624_s1 + $0x228] sm:$0xff]  ;;  %v148_v45 = vld [vmem:[%s2624_s1 + $0x330] sm:$0xff]  ;;  %v130_v46 = vld [vmem:[%s2624_s1 + $0x2a0] sm:$0xff] }
  0x26   :  { %1503 = vmatprep.subr.mxu0 %v140_v6  ;;  %1539 = vmatprep.subr.mxu1 %v173_v7  ;;  %v163_v47 = vld [vmem:[%s2624_s1 + $0x3a8] sm:$0xff]  ;;  %v114_v48 = vld [vmem:[%s2624_s1 + $0x220] sm:$0xff]  ;;  %v129_v50 = vld [vmem:[%s2624_s1 + $0x298] sm:$0xff] }
  0x27   :  { %1504 = vmatpush3.msra.mxu0 %v124_v8  ;;  %1540 = vmatpush3.msra.mxu1 %v157_v9  ;;  %v147_v49 = vld [vmem:[%s2624_s1 + $0x328] sm:$0xff]  ;;  %v162_v51 = vld [vmem:[%s2624_s1 + $0x3a0] sm:$0xff]  ;;  %v113_v52 = vld [vmem:[%s2624_s1 + $0x218] sm:$0xff] }
  0x28   :  { %1505 = vmatprep.subr.mxu0 %v139_v10  ;;  %1541 = vmatprep.subr.mxu1 %v172_v11  ;;  %v146_v53 = vld [vmem:[%s2624_s1 + $0x320] sm:$0xff]  ;;  %v128_v55 = vld [vmem:[%s2624_s1 + $0x290] sm:$0xff]  ;;  %v161_v56 = vld [vmem:[%s2624_s1 + $0x398] sm:$0xff] }
  0x29   :  { %1506 = vmatpush3.msra.mxu0 %v123_v12  ;;  %1542 = vmatpush3.msra.mxu1 %v156_v13  ;;  %v36_v54 = vld [vmem:[%s2623_s0 + $0x60] sm:$0xff]  ;;  %v35_v57 = vld [vmem:[%s2623_s0 + $0x58] sm:$0xff]  ;;  %v112_v59 = vld [vmem:[%s2624_s1 + $0x210] sm:$0xff] }
  0x2a   :  { %1507 = vmatprep.subr.mxu0 %v138_v14  ;;  %1543 = vmatprep.subr.mxu1 %v171_v15  ;;  %v145_v58 = vld [vmem:[%s2624_s1 + $0x318] sm:$0xff]  ;;  %v38_v60 = vld [vmem:[%s2623_s0 + $0x70] sm:$0xff]  ;;  %v127_v61 = vld [vmem:[%s2624_s1 + $0x288] sm:$0xff] }
  0x2b   :  { %1508 = vmatpush3.msra.mxu0 %v122_v16  ;;  %1544 = vmatpush3.msra.mxu1 %v155_v17  ;;  %v160_v62 = vld [vmem:[%s2624_s1 + $0x390] sm:$0xff]  ;;  %v37_v63 = vld [vmem:[%s2623_s0 + $0x68] sm:$0xff]  ;;  %v126_v2 = vld [vmem:[%s2624_s1 + $0x280] sm:$0xff] }
  0x2c   :  { %1509 = vmatprep.subr.mxu0 %v137_v18  ;;  %1545 = vmatprep.subr.mxu1 %v170_v19  ;;  %v111_v0 = vld [vmem:[%s2624_s1 + $0x208] sm:$0xff]  ;;  %v144_v1 = vld [vmem:[%s2624_s1 + $0x310] sm:$0xff]  ;;  %v110_v4 = vld [vmem:[%s2624_s1 + $0x200] sm:$0xff] }
  0x2d   :  { %1510 = vmatpush3.msra.mxu0 %v121_v20  ;;  %1546 = vmatpush3.msra.mxu1 %v154_v21  ;;  %v159_v3 = vld [vmem:[%s2624_s1 + $0x388] sm:$0xff] }
  0x2e   :  { %1511 = vmatprep.subr.mxu0 %v136_v22  ;;  %1547 = vmatprep.subr.mxu1 %v169_v23  ;;  %v29_v5 = vld [vmem:[%s2623_s0 + $0x28] sm:$0xff] }
  0x2f   :  { %1512 = vmatpush3.msra.mxu0 %v120_v24  ;;  %1548 = vmatpush3.msra.mxu1 %v153_v25  ;;  %v143_v6 = vld [vmem:[%s2624_s1 + $0x308] sm:$0xff] }
  0x30   :  { %1513 = vmatprep.subr.mxu0 %v135_v26  ;;  %1549 = vmatprep.subr.mxu1 %v168_v27 }
  0x31   :  { %1514 = vmatpush3.msra.mxu0 %v119_v28  ;;  %1550 = vmatpush3.msra.mxu1 %v152_v29 }
  0x32   :  { %1515 = vmatprep.subr.mxu0 %v134_v30  ;;  %1551 = vmatprep.subr.mxu1 %v167_v31 }
  0x33   :  { %1516 = vmatpush3.msra.mxu0 %v118_v32  ;;  %1552 = vmatpush3.msra.mxu1 %v151_v33 }
  0x34   :  { %1517 = vmatprep.subr.mxu0 %v133_v34  ;;  %1553 = vmatprep.subr.mxu1 %v166_v35 }
  0x35   :  { %1518 = vmatpush3.msra.mxu0 %v117_v36  ;;  %1554 = vmatpush3.msra.mxu1 %v150_v37 }
  0x36   :  { %1519 = vmatprep.subr.mxu0 %v132_v38  ;;  %1555 = vmatprep.subr.mxu1 %v165_v39 }
  0x37   :  { %1520 = vmatpush3.msra.mxu0 %v116_v40  ;;  %1556 = vmatpush3.msra.mxu1 %v149_v41 }
  0x38   :  { %1521 = vmatprep.subr.mxu0 %v131_v42  ;;  %1557 = vmatprep.subr.mxu1 %v164_v43 }
  0x39   :  { %1522 = vmatpush3.msra.mxu0 %v115_v44  ;;  %1558 = vmatpush3.msra.mxu1 %v148_v45 }
  0x3a   :  { %1523 = vmatprep.subr.mxu0 %v130_v46  ;;  %1559 = vmatprep.subr.mxu1 %v163_v47 }
  0x3b   :  { %1524 = vmatpush3.msra.mxu0 %v114_v48  ;;  %1560 = vmatpush3.msra.mxu1 %v147_v49 }
  0x3c   :  { %1525 = vmatprep.subr.mxu0 %v129_v50  ;;  %1561 = vmatprep.subr.mxu1 %v162_v51 }
  0x3d   :  { %1526 = vmatpush3.msra.mxu0 %v113_v52  ;;  %1562 = vmatpush3.msra.mxu1 %v146_v53 }
  0x3e   :  { %298 = vmatprep.mubr.f32.mxu0 %v36_v54  ;;  %1527 = vmatprep.subr.mxu0 %v128_v55 }
  0x3f   :  { %1563 = vmatprep.subr.mxu1 %v161_v56  ;;  %299 = vmatmul.mubr.f32.gmra.mxu0 %v35_v57 }
  0x40   :  { %1564 = vmatpush3.msra.mxu1 %v145_v58  ;;  %1528 = vmatpush3.msra.mxu0 %v112_v59 }
  0x41   :  { %373 = vmatprep.mubr.f32.mxu1 %v38_v60  ;;  %1529 = vmatprep.subr.mxu0 %v127_v61 }
  0x42   :  { %1565 = vmatprep.subr.mxu1 %v160_v62  ;;  %374 = vmatmul.mubr.f32.gmra.mxu1 %v37_v63 }
  0x43   :  { %1530 = vmatpush3.msra.mxu0 %v111_v0 }
  0x44   :  { %11 = vsyncpa [#allocation4], 0  ;;  %1566 = vmatpush3.msra.mxu1 %v144_v1  ;;  %1531 = vmatprep.subr.mxu0 %v126_v2  ;;  %v28_v7 = vld [vmem:[%s2623_s0 + $0x20] sm:$0xff]  ;;  %v205_v9 = vld [vmem:[%s2624_s1 + $0x4f8] sm:$0xff]  ;;  %vm222_vm0 = vcmask 588800   ;;  %v1843_v61 = vmov 0.0  }
  0x45   :  { %v158_v8 = vld [vmem:[%s2624_s1 + $0x380] sm:$0xff]  ;;  %1567 = vmatprep.subr.mxu1 %v159_v3  ;;  %1532 = vmatpush3.msra.mxu0 %v110_v4  ;;  %v31_v11 = vld [vmem:[%s2623_s0 + $0x38] sm:$0xff]  ;;  %v30_v13 = vld [vmem:[%s2623_s0 + $0x30] sm:$0xff]  ;;  %vm1844_vm1 = vmmov 0   ;;  %vm679_vm2 = vcmask 320512   ;;  %vm682_vm3 = vcmask 322562  }
  0x46   :  { %v142_v10 = vld [vmem:[%s2624_s1 + $0x300] sm:$0xff]  ;;  %443 = vmatprep.mubr.f32.mxu0 %v29_v5  ;;  %1568 = vmatpush3.msra.mxu1 %v143_v6  ;;  %v189_v12 = vld [vmem:[%s2624_s1 + $0x478] sm:$0xff]  ;;  %v204_v14 = vld [vmem:[%s2624_s1 + $0x4f0] sm:$0xff]  ;;  %vm685_vm4 = vcmask 324612   ;;  %vm688_vm5 = vcmask 326662   ;;  %vm704_vm6 = vcmask 326656  }
  0x47   :  { %444 = vmatmul.mubr.f32.vlgmr.msra.gmra.mxu0 %v28_v7  ;;  %1569 = vmatprep.subr.mxu1 %v158_v8  ;;  %v40_v15 = vld [vmem:[%s2623_s0 + $0x80] sm:$0xff]  ;;  %v188_v16 = vld [vmem:[%s2624_s1 + $0x470] sm:$0xff]  ;;  %v39_v17 = vld [vmem:[%s2623_s0 + $0x78] sm:$0xff]  ;;  %s1845_s15 = smov [#allocation3]   ;;  %vm1397_vm7 = vcmask 25600  }
  0x48   :  { %1577 = vmatprep.subr.mxu0 %v205_v9  ;;  %1570 = vmatpush3.msra.mxu1 %v142_v10  ;;  %v203_v18 = vld [vmem:[%s2624_s1 + $0x4e8] sm:$0xff]  ;;  %v42_v19 = vld [vmem:[%s2623_s0 + $0x90] sm:$0xff]  ;;  %v202_v22 = vld [vmem:[%s2624_s1 + $0x4e0] sm:$0xff]  ;;  %s1405_s16 = sshll.u32 %s1845_s15, 4  ;;  %s1406_s16 = int_to_ptr.vmem [resolvable:$true] %s1405_s16 }
  0x49   :  { %518 = vmatprep.mubr.f32.mxu1 %v31_v11  ;;  %1578 = vmatpush3.msra.mxu0 %v189_v12  ;;  %v187_v20 = vld [vmem:[%s2624_s1 + $0x468] sm:$0xff]  ;;  %v186_v23 = vld [vmem:[%s2624_s1 + $0x460] sm:$0xff]  ;;  %v201_v25 = vld [vmem:[%s2624_s1 + $0x4d8] sm:$0xff]  ;;  %p1826_p1 = scmp.lt.s32.totalorder %s1406_s16, %s1406_s16 }
  0x4a   :  { %519 = vmatmul.mubr.f32.vlgmr.msra.gmra.mxu1 %v30_v13  ;;  %1579 = vmatprep.subr.mxu0 %v204_v14  ;;  %v41_v21 = vld [vmem:[%s2623_s0 + $0x88] sm:$0xff]  ;;  %v214_v24 = vld [vmem:[%s2624_s1 + $0x540] sm:$0xff]  ;;  %v185_v26 = vld [vmem:[%s2624_s1 + $0x458] sm:$0xff] }
  0x4b   :  { %448 = vmatprep.mubr.f32.mxu0 %v40_v15  ;;  %1580 = vmatpush3.msra.mxu0 %v188_v16  ;;  %v213_v27 = vld [vmem:[%s2624_s1 + $0x538] sm:$0xff]  ;;  %v200_v28 = vld [vmem:[%s2624_s1 + $0x4d0] sm:$0xff]  ;;  %v199_v31 = vld [vmem:[%s2624_s1 + $0x4c8] sm:$0xff] }
  0x4c   :  { %449 = vmatmul.mubr.f32.gmra.mxu0 %v39_v17  ;;  %1581 = vmatprep.subr.mxu0 %v203_v18  ;;  %v184_v29 = vld [vmem:[%s2624_s1 + $0x450] sm:$0xff]  ;;  %v183_v32 = vld [vmem:[%s2624_s1 + $0x448] sm:$0xff]  ;;  %v198_v34 = vld [vmem:[%s2624_s1 + $0x4c0] sm:$0xff] }
  0x4d   :  { %523 = vmatprep.mubr.f32.mxu1 %v42_v19  ;;  %1582 = vmatpush3.msra.mxu0 %v187_v20  ;;  %v212_v30 = vld [vmem:[%s2624_s1 + $0x530] sm:$0xff]  ;;  %v211_v33 = vld [vmem:[%s2624_s1 + $0x528] sm:$0xff]  ;;  %v182_v35 = vld [vmem:[%s2624_s1 + $0x440] sm:$0xff] }
  0x4e   :  { %524 = vmatmul.mubr.f32.gmra.mxu1 %v41_v21  ;;  %1583 = vmatprep.subr.mxu0 %v202_v22  ;;  %v210_v36 = vld [vmem:[%s2624_s1 + $0x520] sm:$0xff]  ;;  %v197_v37 = vld [vmem:[%s2624_s1 + $0x4b8] sm:$0xff]  ;;  %v196_v40 = vld [vmem:[%s2624_s1 + $0x4b0] sm:$0xff] }
  0x4f   :  { %1584 = vmatpush3.msra.mxu0 %v186_v23  ;;  %1680 = vmatprep.subr.mxu1 %v214_v24  ;;  %v181_v38 = vld [vmem:[%s2624_s1 + $0x438] sm:$0xff]  ;;  %v180_v41 = vld [vmem:[%s2624_s1 + $0x430] sm:$0xff]  ;;  %v195_v43 = vld [vmem:[%s2624_s1 + $0x4a8] sm:$0xff] }
  0x50   :  { %1585 = vmatprep.subr.mxu0 %v201_v25  ;;  %1681 = vmatpush3.msra.mxu1 %v214_v24  ;;  %v209_v39 = vld [vmem:[%s2624_s1 + $0x518] sm:$0xff]  ;;  %v208_v42 = vld [vmem:[%s2624_s1 + $0x510] sm:$0xff]  ;;  %v179_v44 = vld [vmem:[%s2624_s1 + $0x428] sm:$0xff] }
  0x51   :  { %1586 = vmatpush3.msra.mxu0 %v185_v26  ;;  %1682 = vmatprep.subr.mxu1 %v213_v27  ;;  %v207_v45 = vld [vmem:[%s2624_s1 + $0x508] sm:$0xff]  ;;  %v194_v46 = vld [vmem:[%s2624_s1 + $0x4a0] sm:$0xff]  ;;  %v193_v49 = vld [vmem:[%s2624_s1 + $0x498] sm:$0xff] }
  0x52   :  { %1587 = vmatprep.subr.mxu0 %v200_v28  ;;  %1683 = vmatpush3.msra.mxu1 %v213_v27  ;;  %v33_v47 = vld [vmem:[%s2623_s0 + $0x48] sm:$0xff]  ;;  %v178_v48 = vld [vmem:[%s2624_s1 + $0x420] sm:$0xff]  ;;  %v177_v51 = vld [vmem:[%s2624_s1 + $0x418] sm:$0xff] }
  0x53   :  { %1588 = vmatpush3.msra.mxu0 %v184_v29  ;;  %1684 = vmatprep.subr.mxu1 %v212_v30  ;;  %v206_v50 = vld [vmem:[%s2624_s1 + $0x500] sm:$0xff]  ;;  %v192_v52 = vld [vmem:[%s2624_s1 + $0x490] sm:$0xff]  ;;  %v45_v55 = vld [vmem:[%s2623_s0 + $0xa8] sm:$0xff] }
  0x54   :  { %1589 = vmatprep.subr.mxu0 %v199_v31  ;;  %1685 = vmatpush3.msra.mxu1 %v212_v30  ;;  %v34_v53 = vld [vmem:[%s2623_s0 + $0x50] sm:$0xff]  ;;  %v191_v56 = vld [vmem:[%s2624_s1 + $0x488] sm:$0xff]  ;;  %v2442_v58 = vld [vmem:[%s2625_s2 + $0x20] sm:$0xff] }
  0x55   :  { %1590 = vmatpush3.msra.mxu0 %v183_v32  ;;  %1686 = vmatprep.subr.mxu1 %v211_v33  ;;  %v176_v54 = vld [vmem:[%s2624_s1 + $0x410] sm:$0xff]  ;;  %v175_v57 = vld [vmem:[%s2624_s1 + $0x408] sm:$0xff]  ;;  %v190_v59 = vld [vmem:[%s2624_s1 + $0x480] sm:$0xff] }
  0x56   :  { %1591 = vmatprep.subr.mxu0 %v198_v34  ;;  %1687 = vmatpush3.msra.mxu1 %v211_v33  ;;  %v174_v60 = vld [vmem:[%s2624_s1 + $0x400] sm:$0xff]  ;;  %v2454_v62 = vld [vmem:[%s2625_s2 + $0x18] sm:$0xff]  ;;  %v2467_v1 = vld [vmem:[%s2625_s2 + $0x10] sm:$0xff] }
  0x57   :  { %1592 = vmatpush3.msra.mxu0 %v182_v35  ;;  %1688 = vmatprep.subr.mxu1 %v210_v36  ;;  %v32_v63 = vld [vmem:[%s2623_s0 + $0x40] sm:$0xff]  ;;  %v2474_v2 = vld [vmem:[%s2625_s2 + $0x8] sm:$0xff]  ;;  %v43_v3 = vld [vmem:[%s2623_s0 + $0x98] sm:$0xff] }
  0x58   :  { %1593 = vmatprep.subr.mxu0 %v197_v37  ;;  %1689 = vmatpush3.msra.mxu1 %v210_v36  ;;  %v44_v0 = vld [vmem:[%s2623_s0 + $0xa0] sm:$0xff] }
  0x59   :  { %1594 = vmatpush3.msra.mxu0 %v181_v38  ;;  %1690 = vmatprep.subr.mxu1 %v209_v39  ;;  %v2484_v4 = vld [vmem:[%s2625_s2] sm:$0xff] }
  0x5a   :  { %1595 = vmatprep.subr.mxu0 %v196_v40  ;;  %1691 = vmatpush3.msra.mxu1 %v209_v39  ;;  %v1413_v17 = vld [vmem:[%s2626_s3] ss:$0 sm:$0xff] }
  0x5b   :  { %1596 = vmatpush3.msra.mxu0 %v180_v41  ;;  %1692 = vmatprep.subr.mxu1 %v208_v42 }
  0x5c   :  { %1597 = vmatprep.subr.mxu0 %v195_v43  ;;  %1693 = vmatpush3.msra.mxu1 %v208_v42 }
  0x5d   :  { %1598 = vmatpush3.msra.mxu0 %v179_v44  ;;  %1694 = vmatprep.subr.mxu1 %v207_v45 }
  0x5e   :  { %1599 = vmatprep.subr.mxu0 %v194_v46  ;;  %593 = vmatprep.mubr.f32.mxu0 %v33_v47 }
  0x5f   :  { %1600 = vmatpush3.msra.mxu0 %v178_v48  ;;  %1695 = vmatpush3.msra.mxu1 %v207_v45 }
  0x60   :  { %1601 = vmatprep.subr.mxu0 %v193_v49  ;;  %1696 = vmatprep.subr.mxu1 %v206_v50 }
  0x61   :  { %1602 = vmatpush3.msra.mxu0 %v177_v51  ;;  %1697 = vmatpush3.msra.mxu1 %v206_v50 }
  0x62   :  { %1603 = vmatprep.subr.mxu0 %v192_v52  ;;  %1698 = vmatprep.mubr.msk.f32.mxu1 %vm222_vm0, %v34_v53 }
  0x63   :  { %1604 = vmatpush3.msra.mxu0 %v176_v54  ;;  %1699 = vmatmul.mubr.msk.f32.vlgmr.msra.gmra.mxu1 %vm222_vm0, %v45_v55 }
  0x64   :  { %1605 = vmatprep.subr.mxu0 %v191_v56  ;;  %1701 = vmatprep.subr.mxu1 %v1843_v61 }
  0x65   :  { %1606 = vmatpush3.msra.mxu0 %v175_v57  ;;  %1702 = vmatpush3.msra.mxu1 %v2442_v58 }
  0x66   :  { %1607 = vmatprep.subr.mxu0 %v190_v59  ;;  %1703 = vmatprep.subr.mxu1 %v1843_v61 }
  0x67   :  { %1608 = vmatpush3.msra.mxu0 %v174_v60  ;;  %1704 = vmatpush3.msra.mxu1 %v2454_v62 }
  0x68   :  { %594 = vmatmul.mubr.f32.vlgmr.msra.gmra.mxu0 %v32_v63  ;;  %1705 = vmatprep.subr.mxu1 %v1843_v61 }
  0x69   :  { %598 = vmatprep.mubr.f32.mxu0 %v44_v0  ;;  %1706 = vmatpush3.msra.mxu1 %v2467_v1 }
  0x6a   :  { %1707 = vmatprep.subr.mxu1 %v1843_v61  ;;  %1711 = vmatprep.mubr.msk.f32.mxu1 %vm1844_vm1, %v1843_v61 }
  0x6b   :  { %1708 = vmatpush3.msra.mxu1 %v2474_v2  ;;  %1727 = vmatprep.subr.mxu0 %v1843_v61 }
  0x6c   :  { %599 = vmatmul.mubr.f32.gmra.mxu0 %v43_v3  ;;  %1709 = vmatprep.subr.mxu1 %v1843_v61 }
  0x6d   :  { %1710 = vmatpush3.msra.mxu1 %v2484_v4  ;;  %1728 = vmatpush3.msra.mxu0 %v2442_v58 }
  0x6e   :  { %1712 = vmatmul.mubr.f32.vlgmr.msra.gmra.mxu1 %v1843_v61  ;;  %1714 = vmatprep.subr.mxu1 %v1843_v61 }
  0x6f   :  { %1715 = vmatpush3.msra.mxu1 %v2442_v58  ;;  %1724 = vmatprep.mubr.msk.f32.mxu1 %vm1844_vm1, %v1843_v61 }
  0x70   :  { %1716 = vmatprep.subr.mxu1 %v1843_v61  ;;  %1729 = vmatprep.subr.mxu0 %v1843_v61 }
  0x71   :  { %1717 = vmatpush3.msra.mxu1 %v2454_v62  ;;  %1730 = vmatpush3.msra.mxu0 %v2454_v62 }
  0x72   :  { %1718 = vmatprep.subr.mxu1 %v1843_v61  ;;  %1731 = vmatprep.subr.mxu0 %v1843_v61 }
  0x73   :  { %1719 = vmatpush3.msra.mxu1 %v2467_v1  ;;  %1732 = vmatpush3.msra.mxu0 %v2467_v1 }
  0x74   :  { %1720 = vmatprep.subr.mxu1 %v1843_v61  ;;  %1733 = vmatprep.subr.mxu0 %v1843_v61 }
  0x75   :  { %1721 = vmatpush3.msra.mxu1 %v2474_v2  ;;  %1734 = vmatpush3.msra.mxu0 %v2474_v2 }
  0x76   :  { %1722 = vmatprep.subr.mxu1 %v1843_v61  ;;  %1735 = vmatprep.subr.mxu0 %v1843_v61 }
  0x77   :  { %1723 = vmatpush3.msra.mxu1 %v2484_v4  ;;  %1736 = vmatpush3.msra.mxu0 %v2484_v4 }
  0x78   :  { %1737 = vmatprep.mubr.msk.f32.mxu0 %vm1844_vm1, %v1843_v61  ;;  %1740 = vmatprep.subr.mxu1 %v1843_v61 }
  0x79   :  { %1753 = vmatprep.subr.mxu0 %v1843_v61 }
  0xe2   :  { %v1457_v5 = vpop.f32.mrf.mxu0 }
  0xe4   :  { %v1458_v7 = vpop.f32.mrf.mxu0 }
  0xe5   :  { %v1495_v6 = vpop.f32.mrf.mxu1  ;;  %v1459_v16 = vadd.f32 %v1458_v7, %v1457_v5 }
  0xe7   :  { %v1496_v8 = vpop.f32.mrf.mxu1  ;;  %v296_v20 = vadd.f32 %v1459_v16, %v1413_v17 }
  0xe8   :  { %v1497_v21 = vadd.f32 %v1496_v8, %v1495_v6 }
  0xea   :  { %v371_v26 = vadd.f32 %v1497_v21, %v296_v20 }
  0xff   :  { %v1460_v9 = vpop.f32.mrf.mxu0 }
 0x101   :  { %v1461_v11 = vpop.f32.mrf.mxu0 }
 0x102   :  { %v1498_v10 = vpop.f32.mrf.mxu1  ;;  %v1462_v22 = vadd.f32 %v1461_v11, %v1460_v9 }
 0x104   :  { %v1499_v12 = vpop.f32.mrf.mxu1  ;;  %v301_v27 = vadd.f32 %v1462_v22, %v1413_v17 }
 0x105   :  { %v1500_v28 = vadd.f32 %v1499_v12, %v1498_v10 }
 0x107   :  { %v1533_v13 = vpop.f32.mrf.mxu0  ;;  %v376_v35 = vadd.f32 %v1500_v28, %v301_v27 }
 0x109   :  { %v1534_v15 = vpop.f32.mrf.mxu0 }
 0x10a   :  { %v1571_v14 = vpop.f32.mrf.mxu1  ;;  %v1535_v24 = vadd.f32 %v1534_v15, %v1533_v13 }
 0x10c   :  { %v1572_v18 = vpop.f32.mrf.mxu1  ;;  %v1536_v19 = vpop.f32.mrf.mxu0  ;;  %v446_v30 = vadd.f32 %v1535_v24, %v371_v26  ;;  %v1314_v24 = vld [vmem:[%s2627_s4 + $0x10] sm:$0xff]  ;;  %v1312_v26 = vld [vmem:[%s2627_s4] sm:$0xff] }
 0x10d   :  { %v1573_v31 = vadd.f32 %v1572_v18, %v1571_v14 }
 0x10e   :  { %v1574_v23 = vpop.f32.mrf.mxu1  ;;  %v1537_v25 = vpop.f32.mrf.mxu0 }
 0x10f   :  { %v1538_v32 = vadd.f32 %v1537_v25, %v1536_v19  ;;  %v521_v37 = vadd.f32 %v1573_v31, %v446_v30  ;;  %v1313_v25 = vld [vmem:[%s2627_s4 + $0x8] sm:$0xff] }
 0x110   :  { %v1575_v29 = vpop.f32.mrf.mxu1 }
 0x111   :  { %v451_v38 = vadd.f32 %v1538_v32, %v376_v35  ;;  %v1576_v39 = vadd.f32 %v1575_v29, %v1574_v23  ;;  %v1423_v32 = vld [vmem:[%s2628_s5] ss:$0 sm:$0xff] }
 0x113   :  { %v526_v46 = vadd.f32 %v1576_v39, %v451_v38 }
 0x123   :  { %v1700_v34 = vpop.f32.mrf.mxu1 }
 0x125   :  { %v670_v42 = vpop.f32.mrf.mxu1 }
 0x128   :  { %v1609_v33 = vpop.f32.mrf.mxu0 }
 0x12a   :  { %v1610_v36 = vpop.f32.mrf.mxu0 }
 0x12b   :  { %v1611_v40 = vadd.f32 %v1610_v36, %v1609_v33 }
 0x12c   :  { %v1612_v41 = vpop.f32.mrf.mxu0 }
 0x12d   :  { %v596_v43 = vadd.f32 %v1611_v40, %v521_v37 }
 0x12e   :  { %v1613_v44 = vpop.f32.mrf.mxu0  ;;  %v774_v45 = vpop.f32.mrf.mxu1 }
 0x12f   :  { %v671_v47 = vadd.f32 %v670_v42, %v596_v43  ;;  %v1614_v48 = vadd.f32 %v1613_v44, %v1612_v41 }
 0x130   :  { %v1713_v49 = vpop.f32.mrf.mxu1 }
 0x131   :  { %680 = vst.msk [vmem:[#allocation2] sm:$0x3] %vm679_vm2, %v671_v47  ;;  %v601_v50 = vadd.f32 %v1614_v48, %v526_v46 }
 0x132   :  { %683 = vst.msk [vmem:[#allocation2] sm:$0xc] %vm682_vm3, %v671_v47 }
 0x133   :  { %686 = vst.msk [vmem:[#allocation2] sm:$0x30] %vm685_vm4, %v671_v47  ;;  %v676_v51 = vadd.f32 %v1700_v34, %v601_v50 }
 0x134   :  { %689 = vst.msk [vmem:[#allocation2] sm:$0xc0] %vm688_vm5, %v671_v47 }
 0x135   :  { %691 = vst.msk [vmem:[#allocation2 + $0x8] sm:$0x3] %vm679_vm2, %v676_v51 }
 0x136   :  { %693 = vst.msk [vmem:[#allocation2 + $0x8] sm:$0xc] %vm682_vm3, %v676_v51 }
 0x137   :  { %695 = vst.msk [vmem:[#allocation2 + $0x8] sm:$0x30] %vm685_vm4, %v676_v51 }
 0x138   :  { %697 = vst.msk [vmem:[#allocation2 + $0x8] sm:$0xc0] %vm688_vm5, %v676_v51  ;;  %v703_v52 = vld [vmem:[#allocation2] sm:$0x3] }
 0x139   :  { %v778_v53 = vadd.f32 %v774_v45, %v703_v52  ;;  %v780_v55 = vld [vmem:[#allocation2 + $0x2] sm:$0x3] }
 0x13a   :  { %v856_v63 = vld [vmem:[#allocation2 + $0x4] sm:$0x3] }
 0x13b   :  { %v779_v54 = vmax.f32 %v778_v53, 0.0  ;;  %v932_v7 = vld [vmem:[#allocation2 + $0x6] sm:$0x3] }
 0x13c   :  { %v1008_v12 = vld [vmem:[#allocation2 + $0x8] sm:$0x3] }
 0x13d   :  { %1725 = vmatmul.mubr.msk.f32.vlgmr.msra.gmra.mxu1 %vm704_vm6, %v779_v54 }
 0x13e   :  { %1741 = vmatpush3.msra.mxu1 %v2442_v58  ;;  %1750 = vmatprep.mubr.msk.f32.mxu1 %vm1844_vm1, %v1843_v61 }
 0x13f   :  { %1742 = vmatprep.subr.mxu1 %v1843_v61  ;;  %v1236_v27 = vld [vmem:[#allocation2 + $0xe] sm:$0x3] }
 0x140   :  { %1743 = vmatpush3.msra.mxu1 %v2454_v62 }
 0x141   :  { %1744 = vmatprep.subr.mxu1 %v1843_v61 }
 0x142   :  { %1745 = vmatpush3.msra.mxu1 %v2467_v1 }
 0x143   :  { %1746 = vmatprep.subr.mxu1 %v1843_v61 }
 0x144   :  { %1747 = vmatpush3.msra.mxu1 %v2474_v2 }
 0x145   :  { %1748 = vmatprep.subr.mxu1 %v1843_v61 }
 0x146   :  { %1749 = vmatpush3.msra.mxu1 %v2484_v4 }
 0x147   :  { %1766 = vmatprep.subr.mxu1 %v1843_v61 }
 0x1fd   :  { %v850_v56 = vpop.f32.mrf.mxu1 }
 0x1fe   :  { %v854_v57 = vadd.f32 %v850_v56, %v780_v55 }
 0x1ff   :  { %v1726_v59 = vpop.f32.mrf.mxu1 }
 0x200   :  { %v855_v60 = vmax.f32 %v854_v57, 0.0 }
 0x202   :  { %1738 = vmatmul.mubr.msk.f32.vlgmr.msra.gmra.mxu0 %vm704_vm6, %v855_v60 }
 0x203   :  { %1754 = vmatpush3.msra.mxu0 %v2442_v58  ;;  %1763 = vmatprep.mubr.msk.f32.mxu0 %vm1844_vm1, %v1843_v61 }
 0x204   :  { %1755 = vmatprep.subr.mxu0 %v1843_v61 }
 0x205   :  { %1756 = vmatpush3.msra.mxu0 %v2454_v62 }
 0x206   :  { %1757 = vmatprep.subr.mxu0 %v1843_v61 }
 0x207   :  { %1758 = vmatpush3.msra.mxu0 %v2467_v1 }
 0x208   :  { %1759 = vmatprep.subr.mxu0 %v1843_v61 }
 0x209   :  { %1760 = vmatpush3.msra.mxu0 %v2474_v2 }
 0x20a   :  { %1761 = vmatprep.subr.mxu0 %v1843_v61 }
 0x20b   :  { %1762 = vmatpush3.msra.mxu0 %v2484_v4 }
 0x20c   :  { %1779 = vmatprep.subr.mxu0 %v1843_v61 }
 0x2c2   :  { %v926_v0 = vpop.f32.mrf.mxu0 }
 0x2c3   :  { %v930_v3 = vadd.f32 %v926_v0, %v856_v63 }
 0x2c4   :  { %v1739_v5 = vpop.f32.mrf.mxu0 }
 0x2c5   :  { %v931_v6 = vmax.f32 %v930_v3, 0.0 }
 0x2c7   :  { %1751 = vmatmul.mubr.msk.f32.vlgmr.msra.gmra.mxu1 %vm704_vm6, %v931_v6 }
 0x2c8   :  { %1767 = vmatpush3.msra.mxu1 %v2442_v58  ;;  %1776 = vmatprep.mubr.msk.f32.mxu1 %vm1844_vm1, %v1843_v61 }
 0x2c9   :  { %1768 = vmatprep.subr.mxu1 %v1843_v61 }
 0x2ca   :  { %1769 = vmatpush3.msra.mxu1 %v2454_v62 }
 0x2cb   :  { %1770 = vmatprep.subr.mxu1 %v1843_v61 }
 0x2cc   :  { %1771 = vmatpush3.msra.mxu1 %v2467_v1 }
 0x2cd   :  { %1772 = vmatprep.subr.mxu1 %v1843_v61 }
 0x2ce   :  { %1773 = vmatpush3.msra.mxu1 %v2474_v2 }
 0x2cf   :  { %1774 = vmatprep.subr.mxu1 %v1843_v61 }
 0x2d0   :  { %1775 = vmatpush3.msra.mxu1 %v2484_v4 }
 0x2d1   :  { %1792 = vmatprep.subr.mxu1 %v1843_v61 }
 0x387   :  { %v1002_v8 = vpop.f32.mrf.mxu1 }
 0x388   :  { %v1006_v9 = vadd.f32 %v1002_v8, %v932_v7 }
 0x389   :  { %v1752_v10 = vpop.f32.mrf.mxu1 }
 0x38a   :  { %v1007_v11 = vmax.f32 %v1006_v9, 0.0 }
 0x38c   :  { %1764 = vmatmul.mubr.msk.f32.vlgmr.msra.gmra.mxu0 %vm704_vm6, %v1007_v11 }
 0x38d   :  { %1780 = vmatpush3.msra.mxu0 %v2442_v58  ;;  %1789 = vmatprep.mubr.msk.f32.mxu0 %vm1844_vm1, %v1843_v61 }
 0x38e   :  { %1781 = vmatprep.subr.mxu0 %v1843_v61 }
 0x38f   :  { %1782 = vmatpush3.msra.mxu0 %v2454_v62 }
 0x390   :  { %1783 = vmatprep.subr.mxu0 %v1843_v61 }
 0x391   :  { %1784 = vmatpush3.msra.mxu0 %v2467_v1 }
 0x392   :  { %1785 = vmatprep.subr.mxu0 %v1843_v61 }
 0x393   :  { %1786 = vmatpush3.msra.mxu0 %v2474_v2 }
 0x394   :  { %1787 = vmatprep.subr.mxu0 %v1843_v61 }
 0x395   :  { %1788 = vmatpush3.msra.mxu0 %v2484_v4 }
 0x396   :  { %1805 = vmatprep.subr.mxu0 %v1843_v61 }
 0x44c   :  { %v1078_v13 = vpop.f32.mrf.mxu0 }
 0x44d   :  { %v1082_v14 = vadd.f32 %v1078_v13, %v1008_v12 }
 0x44e   :  { %v1765_v15 = vpop.f32.mrf.mxu0 }
 0x44f   :  { %v1083_v16 = vmax.f32 %v1082_v14, 0.0 }
 0x451   :  { %1777 = vmatmul.mubr.msk.f32.vlgmr.msra.gmra.mxu1 %vm704_vm6, %v1083_v16 }
 0x452   :  { %1793 = vmatpush3.msra.mxu1 %v2442_v58  ;;  %1802 = vmatprep.mubr.msk.f32.mxu1 %vm1844_vm1, %v1843_v61  ;;  %v1084_v58 = vld [vmem:[#allocation2 + $0xa] sm:$0x3] }
 0x453   :  { %1794 = vmatprep.subr.mxu1 %v1843_v61 }
 0x454   :  { %1795 = vmatpush3.msra.mxu1 %v2454_v62  ;;  %v1316_v62 = vld [vmem:[%s2627_s4 + $0x20] sm:$0xff] }
 0x455   :  { %1796 = vmatprep.subr.mxu1 %v1843_v61 }
 0x456   :  { %1797 = vmatpush3.msra.mxu1 %v2467_v1  ;;  %v1315_v1 = vld [vmem:[%s2627_s4 + $0x18] sm:$0xff]  ;;  %s1821_s4 = scalar_lea.vmem %s1406_s16, 32 }
 0x457   :  { %1798 = vmatprep.subr.mxu1 %v1843_v61  ;;  %p1822_p0 = scmp.ne.s32.totalorder %s1406_s16, %s1821_s4  ;;  %p1827_p2 = scmp.lt.s32.totalorder %s1821_s4, %s1821_s4 }
 0x458   :  { %1799 = vmatpush3.msra.mxu1 %v2474_v2  ;;  %v1160_v2 = vld [vmem:[#allocation2 + $0xc] sm:$0x3] }
 0x459   :  { %1800 = vmatprep.subr.mxu1 %v1843_v61  ;;  %p1828_p3 = por %p1827_p2, %p1826_p1 }
 0x45a   :  { %1801 = vmatpush3.msra.mxu1 %v2484_v4 }
 0x45b   :  { %p1829_p4 = pnand %p1828_p3, %p1822_p0 }
 0x511   :  { %v1154_v17 = vpop.f32.mrf.mxu1 }
 0x512   :  { %v1158_v18 = vadd.f32 %v1154_v17, %v1084_v58 }
 0x513   :  { %v1778_v19 = vpop.f32.mrf.mxu1 }
 0x514   :  { %v1159_v20 = vmax.f32 %v1158_v18, 0.0 }
 0x516   :  { %1790 = vmatmul.mubr.msk.f32.vlgmr.msra.gmra.mxu0 %vm704_vm6, %v1159_v20 }
 0x517   :  { %1815 = vmatprep.mubr.msk.f32.mxu0 %vm1844_vm1, %v1843_v61  ;;  %1806 = vmatpush3.msra.mxu0 %v1316_v62 }
 0x518   :  { %1807 = vmatprep.subr.mxu0 %v1843_v61 }
 0x519   :  { %1808 = vmatpush3.msra.mxu0 %v1315_v1 }
 0x51a   :  { %1809 = vmatprep.subr.mxu0 %v1843_v61 }
 0x51b   :  { %1810 = vmatpush3.msra.mxu0 %v1314_v24 }
 0x51c   :  { %1811 = vmatprep.subr.mxu0 %v1843_v61 }
 0x51d   :  { %1812 = vmatpush3.msra.mxu0 %v1313_v25 }
 0x51e   :  { %1813 = vmatprep.subr.mxu0 %v1843_v61 }
 0x51f   :  { %1814 = vmatpush3.msra.mxu0 %v1312_v26 }
 0x5d6   :  { %v1230_v4 = vpop.f32.mrf.mxu0 }
 0x5d7   :  { %v1234_v21 = vadd.f32 %v1230_v4, %v1160_v2 }
 0x5d8   :  { %v1791_v22 = vpop.f32.mrf.mxu0 }
 0x5d9   :  { %v1235_v23 = vmax.f32 %v1234_v21, 0.0 }
 0x5db   :  { %1803 = vmatmul.mubr.msk.f32.vlgmr.msra.gmra.mxu1 %vm704_vm6, %v1235_v23 }
 0x69b   :  { %v1306_v28 = vpop.f32.mrf.mxu1 }
 0x69c   :  { %v1310_v29 = vadd.f32 %v1306_v28, %v1236_v27 }
 0x69d   :  { %v1804_v30 = vpop.f32.mrf.mxu1 }
 0x69e   :  { %v1311_v31 = vmax.f32 %v1310_v29, 0.0 }
 0x6a0   :  { %1816 = vmatmul.mubr.msk.f32.vlgmr.msra.gmra.mxu0 %vm704_vm6, %v1311_v31 }
 0x760   :  { %v1393_v33 = vpop.f32.mrf.mxu0 }
 0x761   :  { %v1394_v34 = vadd.f32 %v1423_v32, %v1393_v33 }
 0x762   :  { %v1817_v35 = vpop.f32.mrf.mxu0 }
 0x763   :  { %1398 = vst.msk [vmem:[#allocation3] sm:$0x3] %vm1397_vm7, %v1394_v34 }
 0x764   :  { %1832 = shalt.err (!%p1829_p4)
}
 0x765   :  { %1408 = dma.vmem_to_hbm [thread:$0]  %s1406_s16, 32, %s2629_s6, [#allocation4]  }
 0x766   :  { %1841 = dma.done.wait [#allocation4], 32  }
 0x767   :  { %1842 = vsyncadd [#allocation4], 4294967264 }
 0x768   :  { %1412 = vsyncpa [#allocation4], 1 }

</bundles_post_ra>
